<compile_context>
chip_gen: v6e
topology: v6e:2x2x1
jax: 0.10.0
libtpu: 0.0.40
codegen_flags: <defaults>
</compile_context>

<pallas_src>
import functools

import jax
import jax.numpy as jnp
from jax.experimental import pallas as pl
from jax.experimental.pallas import tpu as pltpu


def _loss_kernel(ner_logits_ref, ner_labels_ref, sent_logits_ref, sent_labels_ref,
                 out_ref, *, ner_weight, sentiment_weight, part_weight,
                 n_tokens, batch):
    # ---- NER head: per-token cross entropy on this tile ----------------------
    logits = ner_logits_ref[...].astype(jnp.float32)          # (Cn, T)
    labels = ner_labels_ref[...]                               # (1, T) int32
    n_cls, tile_n = logits.shape

    m = jnp.max(logits, axis=0, keepdims=True)                 # (1, T)  sublane reduce
    lse = m + jnp.log(jnp.sum(jnp.exp(logits - m), axis=0, keepdims=True))
    cls_iota = jax.lax.broadcasted_iota(jnp.int32, (n_cls, tile_n), 0)
    onehot = (cls_iota == labels).astype(jnp.float32)          # (Cn, T)
    picked = jnp.sum(logits * onehot, axis=0, keepdims=True)   # (1, T)
    ce = lse - picked                                          # (1, T)

    # label-dependent weights: labels 3 and 4 get part_weight, rest 1.0.
    is_part = jnp.logical_or(labels == 3, labels == 4)
    w = jnp.where(is_part, jnp.float32(part_weight), jnp.float32(1.0))
    # negative labels (token padding / ignore_index) contribute zero loss.
    valid = (labels >= 0).astype(jnp.float32)

    tile_sum = jnp.sum(ce * w * valid, axis=1, keepdims=True)  # (1, 1)
    # weighted mean divides by the true token count N (matches (loss*w).mean()).
    partial = (jnp.float32(ner_weight) / jnp.float32(n_tokens)) * tile_sum

    # ---- Sentiment head: computed once, on grid step 0 -----------------------
    @pl.when(pl.program_id(0) == 0)
    def _():
        s_logits = sent_logits_ref[...].astype(jnp.float32)    # (Cs, B)
        s_labels = sent_labels_ref[...]                        # (1, B) int32
        cs, b = s_logits.shape
        ms = jnp.max(s_logits, axis=0, keepdims=True)
        lse_s = ms + jnp.log(jnp.sum(jnp.exp(s_logits - ms), axis=0, keepdims=True))
        s_iota = jax.lax.broadcasted_iota(jnp.int32, (cs, b), 0)
        s_onehot = (s_iota == s_labels).astype(jnp.float32)
        s_picked = jnp.sum(s_logits * s_onehot, axis=0, keepdims=True)
        sent_loss = jnp.sum(lse_s - s_picked, axis=1, keepdims=True) / jnp.float32(batch)
        total = partial + jnp.float32(sentiment_weight) * sent_loss
        out_ref[...] = jnp.broadcast_to(total, (8, 128))

    @pl.when(pl.program_id(0) != 0)
    def _():
        out_ref[...] = jnp.broadcast_to(partial, (8, 128))


def weighted_multitask_loss(ner_output, ner_labels, sentiment_output, sentiment_labels,
                            ner_weight=0.5, sentiment_weight=0.5, part_weight=2.0,
                            tile_tokens=2048):
    """Matches WeightedMultiTaskLoss.forward.

    ner_output: (B, S, C_ner) float (f32 or bf16)
    ner_labels: (B, S) int
    sentiment_output: (B, C_sent) float
    sentiment_labels: (B,) int
    returns: () float32 scalar
    """
    assert tile_tokens % 128 == 0, "tile_tokens must be a multiple of 128"
    B, S, Cn = ner_output.shape
    Bs, Cs = sentiment_output.shape
    N = B * S

    # token-axis tiling (lane-dense: tokens live on the 128-wide lane axis)
    n_ceil = ((N + 127) // 128) * 128
    tile = min(tile_tokens, n_ceil)
    n_pad = ((N + tile - 1) // tile) * tile
    num_tiles = n_pad // tile

    # Layout plumbing only -- no dtype upcast in the wrapper.
    ner_logits_t = jnp.swapaxes(ner_output.reshape(N, Cn), 0, 1)          # (Cn, N)
    ner_logits_t = jnp.pad(ner_logits_t, ((0, 0), (0, n_pad - N)))        # (Cn, N_pad)
    ner_lbl = jnp.pad(ner_labels.reshape(1, N).astype(jnp.int32),
                      ((0, 0), (0, n_pad - N)), constant_values=-1)       # (1, N_pad)

    sent_logits_t = jnp.swapaxes(sentiment_output, 0, 1)                  # (Cs, B)
    sent_lbl = sentiment_labels.reshape(1, Bs).astype(jnp.int32)          # (1, B)

    kernel = functools.partial(
        _loss_kernel,
        ner_weight=float(ner_weight),
        sentiment_weight=float(sentiment_weight),
        part_weight=float(part_weight),
        n_tokens=N,
        batch=Bs,
    )

    d_in = jnp.dtype(ner_output.dtype).itemsize
    cost = pl.CostEstimate(
        flops=8 * N * Cn + 8 * Bs * Cs,
        transcendentals=N * Cn + N + Bs * Cs + Bs,
        bytes_accessed=n_pad * (Cn * d_in + 4) + Bs * (Cs * d_in + 4)
                       + 8 * 128 * num_tiles * 4,
    )

    partial_slabs = pl.pallas_call(
        kernel,
        out_shape=jax.ShapeDtypeStruct((8, 128 * num_tiles), jnp.float32),
        grid_spec=pltpu.PrefetchScalarGridSpec(
            num_scalar_prefetch=0,
            grid=(num_tiles,),
            in_specs=[
                pl.BlockSpec((Cn, tile), lambda i: (0, i)),   # NER logits tile
                pl.BlockSpec((1, tile), lambda i: (0, i)),    # NER labels tile
                pl.BlockSpec((Cs, Bs), lambda i: (0, 0)),     # sentiment logits (resident)
                pl.BlockSpec((1, Bs), lambda i: (0, 0)),      # sentiment labels (resident)
            ],
            out_specs=pl.BlockSpec((8, 128), lambda i: (0, i)),
        ),
        compiler_params=pltpu.CompilerParams(dimension_semantics=("parallel",)),
        cost_estimate=cost,
    )(ner_logits_t, ner_lbl, sent_logits_t, sent_lbl)

    # Tiny final pairwise reduction over per-tile partial sums.
    partials = partial_slabs[0].reshape(num_tiles, 128)[:, 0]
    return jnp.sum(partials)


def _reference(ner_output, ner_labels, sentiment_output, sentiment_labels,
               ner_weight=0.5, sentiment_weight=0.5, part_weight=2.0):
    # Pure-JAX reference mirroring the PyTorch module.
    B, S, Cn = ner_output.shape
    logits = ner_output.reshape(-1, Cn).astype(jnp.float32)
    labels = ner_labels.reshape(-1)
    logp = jax.nn.log_softmax(logits, axis=-1)
    ner_ce = -jnp.take_along_axis(logp, labels[:, None], axis=-1)[:, 0]
    w = jnp.where((labels == 3) | (labels == 4), part_weight, 1.0)
    ner_loss = jnp.mean(ner_ce * w)
    slogp = jax.nn.log_softmax(sentiment_output.astype(jnp.float32), axis=-1)
    sent_ce = -jnp.take_along_axis(slogp, sentiment_labels[:, None], axis=-1)[:, 0]
    sent_loss = jnp.mean(sent_ce)
    return ner_weight * ner_loss + sentiment_weight * sent_loss


if __name__ == "__main__":
    key = jax.random.PRNGKey(0)

    # ---- Test 1: small shapes from the module spec (single tile) -------------
    k1, k2, k3, k4 = jax.random.split(key, 4)
    B, S, NER_CLASSES, SENT_CLASSES = 2, 8, 5, 3
    ner_output = jax.random.normal(k1, (B, S, NER_CLASSES), dtype=jnp.float32)
    ner_labels = jax.random.randint(k2, (B, S), 0, NER_CLASSES, dtype=jnp.int32)
    sentiment_output = jax.random.normal(k3, (B, SENT_CLASSES), dtype=jnp.float32)
    sentiment_labels = jax.random.randint(k4, (B,), 0, SENT_CLASSES, dtype=jnp.int32)

    loss = weighted_multitask_loss(ner_output, ner_labels,
                                   sentiment_output, sentiment_labels)
    jax.block_until_ready(loss)
    ref = _reference(ner_output, ner_labels, sentiment_output, sentiment_labels)
    assert jnp.allclose(loss, ref, atol=1e-5, rtol=1e-5), (loss, ref)

    # ---- Test 2: multi-tile path, padding, bf16 passthrough -------------------
    k5, k6, k7, k8 = jax.random.split(jax.random.PRNGKey(1), 4)
    B2, S2, CN2, CS2 = 4, 300, 7, 3          # N = 1200 -> padded to 1536 -> 3 tiles of 512
    ner_output2 = jax.random.normal(k5, (B2, S2, CN2), dtype=jnp.bfloat16)
    ner_labels2 = jax.random.randint(k6, (B2, S2), 0, CN2, dtype=jnp.int32)
    sentiment_output2 = jax.random.normal(k7, (B2, CS2), dtype=jnp.bfloat16)
    sentiment_labels2 = jax.random.randint(k8, (B2,), 0, CS2, dtype=jnp.int32)

    loss2 = weighted_multitask_loss(ner_output2, ner_labels2,
                                    sentiment_output2, sentiment_labels2,
                                    ner_weight=0.4, sentiment_weight=0.6,
                                    part_weight=3.0, tile_tokens=512)
    jax.block_until_ready(loss2)
    ref2 = _reference(ner_output2, ner_labels2, sentiment_output2, sentiment_labels2,
                      ner_weight=0.4, sentiment_weight=0.6, part_weight=3.0)
    assert jnp.allclose(loss2, ref2, atol=1e-5, rtol=1e-5), (loss2, ref2)

    print("KERNEL_OK")
</pallas_src>

<mosaic_0001>
module attributes {stable_mosaic.version = 11 : i64} {
  func.func @_loss_kernel(%arg0: i32, %arg1: memref<5x128xf32, #tpu.memory_space<vmem>>, %arg2: memref<1x128xi32, #tpu.memory_space<vmem>>, %arg3: memref<3x2xf32, #tpu.memory_space<vmem>>, %arg4: memref<1x2xi32, #tpu.memory_space<vmem>>, %arg5: memref<8x128xf32, #tpu.memory_space<vmem>>) attributes {dimension_semantics = [#tpu.dimension_semantics<parallel>], iteration_bounds = array<i64: 1>, scalar_prefetch = 0 : i64, scratch_operands = 0 : i64, tpu.core_type = #tpu.core_type<tc>, window_params = [{transform_indices = @transform_0, window_bounds = array<i64: 5, 128>}, {transform_indices = @transform_1, window_bounds = array<i64: 1, 128>}, {pipeline_mode = #tpu.pipeline_mode<synchronous>, transform_indices = @transform_2, window_bounds = array<i64: 3, 2>}, {pipeline_mode = #tpu.pipeline_mode<synchronous>, transform_indices = @transform_3, window_bounds = array<i64: 1, 2>}, {transform_indices = @transform_4, window_bounds = array<i64: 8, 128>}]} {
    %c0 = arith.constant 0 : index
    %c0_0 = arith.constant 0 : index
    %0 = vector.load %arg1[%c0, %c0_0] : memref<5x128xf32, #tpu.memory_space<vmem>>, vector<5x128xf32>
    %c0_1 = arith.constant 0 : index
    %c0_2 = arith.constant 0 : index
    %1 = vector.load %arg2[%c0_1, %c0_2] : memref<1x128xi32, #tpu.memory_space<vmem>>, vector<1x128xi32>
    %cst = arith.constant dense<0xFF800000> : vector<128xf32>
    %2 = vector.multi_reduction <maximumf>, %0, %cst [0] : vector<5x128xf32> to vector<128xf32>
    %3 = vector.shape_cast %2 : vector<128xf32> to vector<1x128xf32>
    %4 = vector.broadcast %3 : vector<1x128xf32> to vector<5x128xf32>
    %5 = arith.subf %0, %4 : vector<5x128xf32>
    %6 = math.exp %5 : vector<5x128xf32>
    %cst_3 = arith.constant dense<0.000000e+00> : vector<128xf32>
    %7 = vector.multi_reduction <add>, %6, %cst_3 [0] : vector<5x128xf32> to vector<128xf32>
    %8 = vector.shape_cast %7 : vector<128xf32> to vector<1x128xf32>
    %9 = math.log %8 : vector<1x128xf32>
    %10 = arith.addf %3, %9 : vector<1x128xf32>
    %11 = tpu.iota {dimensions = array<i32: 0>} : vector<5x128xi32>
    %12 = vector.broadcast %1 : vector<1x128xi32> to vector<5x128xi32>
    %13 = arith.cmpi eq, %11, %12 : vector<5x128xi32>
    %14 = arith.extui %13 : vector<5x128xi1> to vector<5x128xi32>
    %15 = arith.sitofp %14 : vector<5x128xi32> to vector<5x128xf32>
    %16 = arith.mulf %0, %15 : vector<5x128xf32>
    %cst_4 = arith.constant dense<0.000000e+00> : vector<128xf32>
    %17 = vector.multi_reduction <add>, %16, %cst_4 [0] : vector<5x128xf32> to vector<128xf32>
    %18 = vector.shape_cast %17 : vector<128xf32> to vector<1x128xf32>
    %19 = arith.subf %10, %18 : vector<1x128xf32>
    %c3_i32 = arith.constant 3 : i32
    %20 = vector.broadcast %c3_i32 : i32 to vector<1x128xi32>
    %21 = arith.cmpi eq, %1, %20 : vector<1x128xi32>
    %c4_i32 = arith.constant 4 : i32
    %22 = vector.broadcast %c4_i32 : i32 to vector<1x128xi32>
    %23 = arith.cmpi eq, %1, %22 : vector<1x128xi32>
    %24 = arith.ori %21, %23 : vector<1x128xi1>
    %cst_5 = arith.constant 2.000000e+00 : f32
    %cst_6 = arith.constant 1.000000e+00 : f32
    %25 = vector.broadcast %cst_5 : f32 to vector<1x128xf32>
    %26 = vector.broadcast %cst_6 : f32 to vector<1x128xf32>
    %27 = arith.select %24, %25, %26 : vector<1x128xi1>, vector<1x128xf32>
    %c0_i32 = arith.constant 0 : i32
    %28 = vector.broadcast %c0_i32 : i32 to vector<1x128xi32>
    %29 = arith.cmpi sge, %1, %28 : vector<1x128xi32>
    %30 = arith.extui %29 : vector<1x128xi1> to vector<1x128xi32>
    %31 = arith.sitofp %30 : vector<1x128xi32> to vector<1x128xf32>
    %32 = arith.mulf %19, %27 : vector<1x128xf32>
    %33 = arith.mulf %32, %31 : vector<1x128xf32>
    %cst_7 = arith.constant dense<0.000000e+00> : vector<1xf32>
    %34 = vector.multi_reduction <add>, %33, %cst_7 [1] : vector<1x128xf32> to vector<1xf32>
    %35 = vector.shape_cast %34 : vector<1xf32> to vector<1x1xf32>
    %cst_8 = arith.constant 5.000000e-01 : f32
    %cst_9 = arith.constant 1.600000e+01 : f32
    %36 = arith.divf %cst_8, %cst_9 : f32
    %37 = vector.broadcast %36 : f32 to vector<1x1xf32>
    %38 = arith.mulf %37, %35 : vector<1x1xf32>
    %c0_i32_10 = arith.constant 0 : i32
    %39 = arith.cmpi eq, %arg0, %c0_i32_10 : i32
    %40 = arith.extui %39 : i1 to i32
    %c0_i32_11 = arith.constant 0 : i32
    %41 = arith.cmpi ne, %40, %c0_i32_11 : i32
    scf.if %41 {
      %c0_14 = arith.constant 0 : index
      %c0_15 = arith.constant 0 : index
      %45 = vector.load %arg3[%c0_14, %c0_15] : memref<3x2xf32, #tpu.memory_space<vmem>>, vector<3x2xf32>
      %c0_16 = arith.constant 0 : index
      %c0_17 = arith.constant 0 : index
      %46 = vector.load %arg4[%c0_16, %c0_17] : memref<1x2xi32, #tpu.memory_space<vmem>>, vector<1x2xi32>
      %cst_18 = arith.constant dense<0xFF800000> : vector<2xf32>
      %47 = vector.multi_reduction <maximumf>, %45, %cst_18 [0] : vector<3x2xf32> to vector<2xf32>
      %48 = vector.shape_cast %47 : vector<2xf32> to vector<1x2xf32>
      %49 = vector.broadcast %48 : vector<1x2xf32> to vector<3x2xf32>
      %50 = arith.subf %45, %49 : vector<3x2xf32>
      %51 = math.exp %50 : vector<3x2xf32>
      %cst_19 = arith.constant dense<0.000000e+00> : vector<2xf32>
      %52 = vector.multi_reduction <add>, %51, %cst_19 [0] : vector<3x2xf32> to vector<2xf32>
      %53 = vector.shape_cast %52 : vector<2xf32> to vector<1x2xf32>
      %54 = math.log %53 : vector<1x2xf32>
      %55 = arith.addf %48, %54 : vector<1x2xf32>
      %56 = tpu.iota {dimensions = array<i32: 0>} : vector<3x2xi32>
      %57 = vector.broadcast %46 : vector<1x2xi32> to vector<3x2xi32>
      %58 = arith.cmpi eq, %56, %57 : vector<3x2xi32>
      %59 = arith.extui %58 : vector<3x2xi1> to vector<3x2xi32>
      %60 = arith.sitofp %59 : vector<3x2xi32> to vector<3x2xf32>
      %61 = arith.mulf %45, %60 : vector<3x2xf32>
      %cst_20 = arith.constant dense<0.000000e+00> : vector<2xf32>
      %62 = vector.multi_reduction <add>, %61, %cst_20 [0] : vector<3x2xf32> to vector<2xf32>
      %63 = vector.shape_cast %62 : vector<2xf32> to vector<1x2xf32>
      %64 = arith.subf %55, %63 : vector<1x2xf32>
      %cst_21 = arith.constant dense<0.000000e+00> : vector<1xf32>
      %65 = vector.multi_reduction <add>, %64, %cst_21 [1] : vector<1x2xf32> to vector<1xf32>
      %66 = vector.shape_cast %65 : vector<1xf32> to vector<1x1xf32>
      %cst_22 = arith.constant 2.000000e+00 : f32
      %67 = vector.broadcast %cst_22 : f32 to vector<1x1xf32>
      %68 = arith.divf %66, %67 : vector<1x1xf32>
      %cst_23 = arith.constant 5.000000e-01 : f32
      %69 = vector.broadcast %cst_23 : f32 to vector<1x1xf32>
      %70 = arith.mulf %69, %68 : vector<1x1xf32>
      %71 = arith.addf %38, %70 : vector<1x1xf32>
      %72 = vector.shape_cast %71 : vector<1x1xf32> to vector<1x1xf32>
      %73 = vector.broadcast %72 : vector<1x1xf32> to vector<8x128xf32>
      %c0_24 = arith.constant 0 : index
      %c0_25 = arith.constant 0 : index
      %74 = vector.load %arg5[%c0_24, %c0_25] : memref<8x128xf32, #tpu.memory_space<vmem>>, vector<8x128xf32>
      tpu.vector_store %arg5[%c0_24, %c0_25], %73 {strides = array<i32>} : memref<8x128xf32, #tpu.memory_space<vmem>>, vector<8x128xf32>,
    } else {
    }
    %c0_i32_12 = arith.constant 0 : i32
    %42 = arith.cmpi ne, %arg0, %c0_i32_12 : i32
    %43 = arith.extui %42 : i1 to i32
    %c0_i32_13 = arith.constant 0 : i32
    %44 = arith.cmpi ne, %43, %c0_i32_13 : i32
    scf.if %44 {
      %45 = vector.shape_cast %38 : vector<1x1xf32> to vector<1x1xf32>
      %46 = vector.broadcast %45 : vector<1x1xf32> to vector<8x128xf32>
      %c0_14 = arith.constant 0 : index
      %c0_15 = arith.constant 0 : index
      %47 = vector.load %arg5[%c0_14, %c0_15] : memref<8x128xf32, #tpu.memory_space<vmem>>, vector<8x128xf32>
      tpu.vector_store %arg5[%c0_14, %c0_15], %46 {strides = array<i32>} : memref<8x128xf32, #tpu.memory_space<vmem>>, vector<8x128xf32>,
    } else {
    }
    return
  }
  func.func @transform_0(%arg0: i32) -> (i32, i32) {
    %c0_i32 = arith.constant 0 : i32
    %c0_i32_0 = arith.constant 0 : i32
    return %c0_i32, %arg0 : i32, i32
  }
  func.func @transform_1(%arg0: i32) -> (i32, i32) {
    %c0_i32 = arith.constant 0 : i32
    %c0_i32_0 = arith.constant 0 : i32
    return %c0_i32, %arg0 : i32, i32
  }
  func.func @transform_2(%arg0: i32) -> (i32, i32) {
    %c0_i32 = arith.constant 0 : i32
    %c0_i32_0 = arith.constant 0 : i32
    %c0_i32_1 = arith.constant 0 : i32
    return %c0_i32, %c0_i32_0 : i32, i32
  }
  func.func @transform_3(%arg0: i32) -> (i32, i32) {
    %c0_i32 = arith.constant 0 : i32
    %c0_i32_0 = arith.constant 0 : i32
    %c0_i32_1 = arith.constant 0 : i32
    return %c0_i32, %c0_i32_0 : i32, i32
  }
  func.func @transform_4(%arg0: i32) -> (i32, i32) {
    %c0_i32 = arith.constant 0 : i32
    %c0_i32_0 = arith.constant 0 : i32
    return %c0_i32, %arg0 : i32, i32
  }
}

</mosaic_0001>

<bundles_post_ra>
// kernel: tpu_custom_call.1
= control target key start
LH: loop header
LB: loop body
LE: loop exit
PB: predicated region body
PF: predicated region fallthrough
CT: control target
= control target key end

     0   :  { %9 = vsyncpa [#allocation3], 0  ;;  %s284_s0 = inlined_call_operand.hbm [shape: f32[5,128], index: 0, kind: input, shape index: {}]   ;;  %s285_s1 = inlined_call_operand.vmem [shape: s32[1,128], index: 1, kind: input, shape index: {}]   ;;  %s286_s2 = inlined_call_operand.vmem [shape: f32[3,2], index: 2, kind: input, shape index: {}]   ;;  %s287_s3 = inlined_call_operand.vmem [shape: s32[1,2], index: 3, kind: input, shape index: {}]   ;;  %s288_s4 = inlined_call_operand.hbm [shape: f32[8,128], index: 4, kind: output, shape index: {}]  }
   0x1   :  { %10 = vsyncpa [#allocation4], 0  ;;  %s225_s15 = smov [#allocation2]  }
   0x2   :  { %s17_s16 = sshll.u32 %s225_s15, 4  ;;  %s18_s16 = int_to_ptr.vmem [resolvable:$true] %s17_s16 }
   0x3   :  { %s189_s17 = scalar_lea.vmem %s18_s16, 128  ;;  %p194_p1 = scmp.lt.s32.totalorder %s18_s16, %s18_s16 }
   0x4   :  { %p190_p0 = scmp.ne.s32.totalorder %s18_s16, %s189_s17  ;;  %p195_p2 = scmp.lt.s32.totalorder %s189_s17, %s189_s17 }
   0x6   :  { %p196_p3 = por %p195_p2, %p194_p1 }
   0x8   :  { %p197_p4 = pnand %p196_p3, %p190_p0 }
   0xa   :  { %200 = shalt.err (!%p197_p4)
}
   0xb   :  { %20 = dma.hbm_to_vmem [thread:$0]  %s284_s0, 128, %s18_s16, [#allocation3]  }
   0xc   :  { %221 = dma.done.wait [#allocation3], 128  }
   0xd   :  { %222 = vsyncadd [#allocation3], 4294967168  ;;  %vm91_vm0 = vcmask 10240   ;;  %vm32_vm1 = vcmask 1044480   ;;  %v89_v0 = vld [vmem:[%s286_s2] sm:$0x7]  ;;  %v53_v14 = vlaneseq }
   0xe   :  { %v30_v1 = vld [vmem:[#allocation2] sm:$0x1f]  ;;  %v92_v2 = vsel %vm91_vm0, %v89_v0, -inf  ;;  %v226_v26 = vmov 0.0   ;;  %vm128_vm7 = vcmask 15360   ;;  %vm80_vm9 = vcmask 1040384  }
   0xf   :  { %v33_v3 = vsel %vm32_vm1, %v30_v1, -inf  ;;  %v93_v4 = vrot.slane %v92_v2, 4  ;;  %v262_v19 = vshrl.u32 %v53_v14, 7  ;;  %v31_v23 = vld [vmem:[%s285_s1] sm:$0x1]  ;;  %s228_s1 = smov [#allocation5]  }
  0x10   :  { %v34_v5 = vrot.slane %v33_v3, 4  ;;  %v167_v24 = vld [vmem:[%s287_s3] ss:$0 sm:$0xff]  ;;  %vm71_vm4 = vcmp.eq.s32.totalorder %v31_v23, 3  ;;  %vm72_vm5 = vcmp.eq.s32.totalorder %v31_v23, 4  ;;  %vm75_vm8 = vcmp.ge.s32.totalorder %v31_v23, 0 }
  0x11   :  { %v94_v6 = vmax.f32 %v92_v2, %v93_v4  ;;  %v57_v22 = vsub.s32 0, %v262_v19  ;;  %vm116_vm2 = vcmp.eq.s32.totalorder %v262_v19, %v167_v24  ;;  %vm73_vm6 = vmor %vm71_vm4, %vm72_vm5  ;;  %v227_v4 = vmov 1.0   ;;  %s156_s3 = sshll.u32 %s228_s1, 4  ;;  %s157_s3 = int_to_ptr.vmem [resolvable:$true] %s156_s3 }
  0x12   :  { %v35_v7 = vmax.f32 %v33_v3, %v34_v5  ;;  %v168_v27 = vsel %vm116_vm2, 1.0, %v226_v26  ;;  %v74_v5 = vsel %vm73_vm6, 2.0, %v227_v4  ;;  %s201_s24 = scalar_lea.vmem %s157_s3, 128  ;;  %p206_p6 = scmp.lt.s32.totalorder %s157_s3, %s157_s3 }
  0x13   :  { %v95_v8 = vrot.slane %v94_v6, 2  ;;  %v58_v25 = vrot.slane %v31_v23, %v57_v22  ;;  %v119_v32 = vmul.f32 %v168_v27, %v89_v0  ;;  %p202_p5 = scmp.ne.s32.totalorder %s157_s3, %s201_s24  ;;  %p207_p7 = scmp.lt.s32.totalorder %s201_s24, %s201_s24 }
  0x14   :  { %v36_v9 = vrot.slane %v35_v7, 2 }
  0x15   :  { %v96_v10 = vmax.f32 %v94_v6, %v95_v8  ;;  %vm59_vm3 = vcmp.eq.s32.totalorder %v262_v19, %v58_v25  ;;  %v120_v38 = vsel %vm91_vm0, %v119_v32, 0.0  ;;  %v166_v8 = vsel %vm75_vm8, 1.0, %v226_v26  ;;  %p208_p8 = por %p207_p7, %p206_p6 }
  0x16   :  { %v37_v11 = vmax.f32 %v35_v7, %v36_v9  ;;  %v165_v28 = vsel %vm59_vm3, 1.0, %v226_v26  ;;  %v121_v44 = vrot.slane %v120_v38, 4 }
  0x17   :  { %v97_v12 = vrot.slane %v96_v10, 1  ;;  %v62_v35 = vmul.f32 %v165_v28, %v30_v1  ;;  %p209_p9 = pnand %p208_p8, %p202_p5 }
  0x18   :  { %v38_v13 = vrot.slane %v37_v11, 1  ;;  %v122_v50 = vadd.f32 %v121_v44, %v120_v38 }
  0x19   :  { %v98_v15 = vmax.f32 %v96_v10, %v97_v12  ;;  %v63_v41 = vsel %vm32_vm1, %v62_v35, 0.0 }
  0x1a   :  { %v39_v16 = vmax.f32 %v37_v11, %v38_v13  ;;  %v64_v46 = vrot.slane %v63_v41, 4  ;;  %v123_v53 = vrot.slane %v122_v50, 2 }
  0x1b   :  { %v99_v17 = vsub.f32 %v89_v0, %v98_v15 }
  0x1c   :  { %v40_v18 = vsub.f32 %v30_v1, %v39_v16  ;;  %v65_v52 = vadd.f32 %v64_v46, %v63_v41  ;;  %v124_v55 = vadd.f32 %v123_v53, %v122_v50 }
  0x1d   :  { %v100_v20 = vmul.f32 1.442695, %v99_v17 }
  0x1e   :  { %v41_v21 = vmul.f32 1.442695, %v40_v18  ;;  %v66_v54 = vrot.slane %v65_v52, 2  ;;  %v125_v57 = vrot.slane %v124_v55, 1 }
  0x1f   :  { %173 = vpow2.f32 %v100_v20 }
  0x20   :  { %175 = vpow2.f32 %v41_v21  ;;  %v67_v56 = vadd.f32 %v66_v54, %v65_v52  ;;  %v126_v62 = vadd.f32 %v125_v57, %v124_v55 }
  0x22   :  { %v68_v58 = vrot.slane %v67_v56, 1 }
  0x24   :  { %v69_v0 = vadd.f32 %v68_v58, %v67_v56 }
  0x2c   :  { %v174_v29 = vpop.eup %173 }
  0x2d   :  { %v176_v30 = vpop.eup %175  ;;  %v102_v31 = vsel %vm91_vm0, %v174_v29, 0.0 }
  0x2e   :  { %v103_v33 = vrot.slane %v102_v31, 4  ;;  %v43_v34 = vsel %vm32_vm1, %v176_v30, 0.0 }
  0x2f   :  { %v44_v36 = vrot.slane %v43_v34, 4 }
  0x30   :  { %v104_v37 = vadd.f32 %v103_v33, %v102_v31 }
  0x31   :  { %v45_v39 = vadd.f32 %v44_v36, %v43_v34 }
  0x32   :  { %v105_v40 = vrot.slane %v104_v37, 2 }
  0x33   :  { %v46_v42 = vrot.slane %v45_v39, 2 }
  0x34   :  { %v106_v43 = vadd.f32 %v105_v40, %v104_v37 }
  0x35   :  { %v47_v45 = vadd.f32 %v46_v42, %v45_v39 }
  0x36   :  { %v107_v47 = vrot.slane %v106_v43, 1 }
  0x37   :  { %v48_v48 = vrot.slane %v47_v45, 1 }
  0x38   :  { %v108_v49 = vadd.f32 %v107_v47, %v106_v43 }
  0x39   :  { %v49_v51 = vadd.f32 %v48_v48, %v47_v45 }
  0x3a   :  { %177 = vlog2.f32 %v108_v49 }
  0x3b   :  { %179 = vlog2.f32 %v49_v51 }
  0x47   :  { %v178_v59 = vpop.eup %177 }
  0x48   :  { %v180_v60 = vpop.eup %179  ;;  %v110_v61 = vmul.f32 0.6931472, %v178_v59 }
  0x49   :  { %v51_v63 = vmul.f32 0.6931472, %v180_v60 }
  0x4a   :  { %v111_v1 = vadd.f32 %v110_v61, %v98_v15 }
  0x4b   :  { %v52_v2 = vadd.f32 %v51_v63, %v39_v16 }
  0x4c   :  { %v127_v3 = vsub.f32 %v111_v1, %v126_v62 }
  0x4d   :  { %v70_v6 = vsub.f32 %v52_v2, %v69_v0 }
  0x4e   :  { %v129_v7 = vsel %vm128_vm7, %v127_v3, 0.0 }
  0x4f   :  { %130 = vadd.xlane.f32.xlu0 %v129_v7  ;;  %v78_v9 = vmul.f32 %v74_v5, %v70_v6 }
  0x51   :  { %v79_v10 = vmul.f32 %v166_v8, %v78_v9 }
  0x53   :  { %v81_v11 = vsel %vm80_vm9, %v79_v10, 0.0 }
  0x54   :  { %82 = vadd.xlane.f32.xlu0 %v81_v11 }
  0xd8   :  { %v131_v12 = vpop.xlane.xlu0 %130 }
  0xd9   :  { %v133_v13 = vmul.f32 0.5, %v131_v12 }
  0xdb   :  { %v134_v17 = vmul.f32 0.5, %v133_v13 }
  0xdd   :  { %v83_v14 = vpop.xlane.xlu0 %82 }
  0xde   :  { %v84_v15 = vmul.f32 0.03125, %v83_v14 }
  0xe0   :  { %v135_v16 = vadd.f32 %v134_v17, %v84_v15 }
  0xe2   :  { %v139_v18 = vrot.slane %v135_v16, %v57_v22 }
  0xe4   :  { %140 = vst [vmem:[#allocation5] sm:$0xff] %v139_v18 }
  0xe5   :  { %212 = shalt.err (!%p209_p9)
}
  0xe6   :  { %159 = dma.vmem_to_hbm [thread:$0]  %s157_s3, 128, %s288_s4, [#allocation4]  }
  0xe7   :  { %223 = dma.done.wait [#allocation4], 128  }
  0xe8   :  { %224 = vsyncadd [#allocation4], 4294967168 }
  0xe9   :  { %163 = vsyncpa [#allocation3], 1 }
  0xea   :  { %164 = vsyncpa [#allocation4], 1 }

</bundles_post_ra>
